<compile_context>
chip_gen: v7x
topology: tpu7x:2x2x1
jax: 0.10.0
libtpu: 0.0.40
codegen_flags: <defaults>
</compile_context>

<pallas_src>
import functools

import jax
import jax.numpy as jnp
from jax.experimental import pallas as pl
from jax.experimental.pallas import tpu as pltpu


# ----------------------------------------------------------------------------
# Mode A ("fused"): all weights resident, one grid step per batch tile.
# ----------------------------------------------------------------------------
def _res_net_fused_kernel(x_ref, w_in_ref, b_in_ref, w_hid_ref, b_hid_ref,
                          w_out_ref, b_out_ref, o_ref, *, num_layers, split):
    """x_ref: (tb, in) bf16; w_hid_ref: (L, H, H) bf16; o_ref: (tb, out_pad) f32."""
    w_in = w_in_ref[...]          # (in, H) bf16
    b_in = b_in_ref[...]          # (1, H) f32
    w_out = w_out_ref[...]        # (H, out_pad) bf16
    b_out = b_out_ref[...]        # (1, out_pad) f32

    def net(xb):
        # xb: (rows, in) bf16 -> (rows, out_pad) f32
        h = jnp.tanh(jnp.dot(xb, w_in, preferred_element_type=jnp.float32) + b_in)
        for l in range(num_layers):            # static unroll; L known at trace
            w = w_hid_ref[l]                   # (H, H) bf16
            b = b_hid_ref[l]                   # (1, H) f32
            z = jnp.dot(h.astype(jnp.bfloat16), w,
                        preferred_element_type=jnp.float32)
            h = h + jnp.tanh(z + b)
        return (jnp.dot(h.astype(jnp.bfloat16), w_out,
                        preferred_element_type=jnp.float32) + b_out)

    if split:
        # Two independent batch sub-chunks (independent dependency chains):
        # MXU matmuls of one chunk overlap the EUP tanh of the other.
        half = x_ref.shape[0] // 2
        o_ref[:half, :] = net(x_ref[:half, :]).astype(o_ref.dtype)
        o_ref[half:, :] = net(x_ref[half:, :]).astype(o_ref.dtype)
    else:
        o_ref[...] = net(x_ref[...]).astype(o_ref.dtype)


# ----------------------------------------------------------------------------
# Mode B ("stream"): layer-streaming, one hidden-weight slab resident at a time.
# ----------------------------------------------------------------------------
def _res_net_stream_kernel(x_ref, w_in_ref, b_in_ref, w_hid_ref, b_hid_ref,
                           w_out_ref, b_out_ref, o_ref, h_ref, *, split):
    """One grid step = one hidden layer for one batch tile.

    x_ref:     (tb, in)       bf16
    w_in_ref:  (in, H)        bf16     b_in_ref:  (1, H)    f32
    w_hid_ref: (1, H, H)      bf16     b_hid_ref: (1, 1, H) f32   (layer l slab)
    w_out_ref: (H, out_pad)   bf16     b_out_ref: (1, out_pad) f32
    o_ref:     (tb, out_pad)  f32
    h_ref:     (tb, H)        f32 VMEM scratch, persists across the layer axis
    """
    l = pl.program_id(1)
    num_layers = pl.num_programs(1)

    # Input layer + activation (only on the first layer step of this tile).
    @pl.when(l == 0)
    def _():
        z = jnp.dot(x_ref[...], w_in_ref[...],
                    preferred_element_type=jnp.float32)
        h_ref[...] = jnp.tanh(z + b_in_ref[...])

    # Residual hidden layer l:  h = h + tanh(h @ W_l + b_l)
    w = w_hid_ref[0]             # (H, H) bf16
    b = b_hid_ref[0]             # (1, H) f32
    h = h_ref[...]               # (tb, H) f32
    hb = h.astype(jnp.bfloat16)  # bf16 only on the MXU operand path

    if split:
        half = h.shape[0] // 2
        z0 = jnp.dot(hb[:half], w, preferred_element_type=jnp.float32)
        z1 = jnp.dot(hb[half:], w, preferred_element_type=jnp.float32)
        h_ref[pl.ds(0, half), :] = h[:half] + jnp.tanh(z0 + b)
        h_ref[pl.ds(half, half), :] = h[half:] + jnp.tanh(z1 + b)
    else:
        z = jnp.dot(hb, w, preferred_element_type=jnp.float32)
        h_ref[...] = h + jnp.tanh(z + b)

    # Output layer (no activation) on the last layer step; lane-dense store.
    @pl.when(l == num_layers - 1)
    def _():
        hb_out = h_ref[...].astype(jnp.bfloat16)
        o_ref[...] = (jnp.dot(hb_out, w_out_ref[...],
                              preferred_element_type=jnp.float32)
                      + b_out_ref[...]).astype(o_ref.dtype)


# ----------------------------------------------------------------------------
# Wrapper
# ----------------------------------------------------------------------------
def _pick_tile_b(B):
    """Largest power-of-two tile that still yields >= 2 grid steps (if possible)."""
    for t in (512, 256, 128, 64, 32, 16, 8):
        if B % t == 0 and t < B:
            return t
    return B


def _fused_vmem_bytes(tb, in_size, hidden, out_pad, num_layers):
    """Rough VMEM footprint of the fused mode (double-buffered pipeline bufs)."""
    per_buf = (tb * in_size * 2                      # x tile (bf16)
               + in_size * hidden * 2                # w_in
               + hidden * 4                          # b_in
               + num_layers * hidden * hidden * 2    # w_hid stack
               + num_layers * hidden * 4             # b_hid
               + hidden * out_pad * 2                # w_out
               + out_pad * 4                         # b_out
               + tb * out_pad * 4)                   # out tile
    return 2 * per_buf


def res_net_forward(x, params, *, tile_b=None, mode="auto", vmem_limit_bytes=None):
    """x: (B, input_size) f32.  params: dict of pre-transposed f32 weights.

    mode: "auto" | "fused" | "stream".
    """
    B, in_size = x.shape
    w_in, b_in = params["w_in"], params["b_in"]        # (in, H), (1, H)
    w_hid, b_hid = params["w_hid"], params["b_hid"]    # (L, H, H), (L, 1, H)
    w_out, b_out = params["w_out"], params["b_out"]    # (H, out), (1, out)
    hidden = w_in.shape[1]
    out_size = w_out.shape[1]
    num_layers = w_hid.shape[0]
    assert num_layers >= 1, "kernel assumes at least one hidden layer"

    tb = tile_b if tile_b is not None else _pick_tile_b(B)
    assert B % tb == 0
    split = (tb >= 16) and (tb % 16 == 0)

    # Lane-dense output: pad output features to a multiple of 128 lanes.
    out_pad = -(-out_size // 128) * 128
    w_out_p = jnp.pad(w_out, ((0, 0), (0, out_pad - out_size)))
    b_out_p = jnp.pad(b_out, ((0, 0), (0, out_pad - out_size)))

    # bf16 MXU operands; biases stay f32 (added to the f32 accumulator).
    x_bf = x.astype(jnp.bfloat16)
    w_in_bf = w_in.astype(jnp.bfloat16)
    w_hid_bf = w_hid.astype(jnp.bfloat16)
    w_out_bf = w_out_p.astype(jnp.bfloat16)

    if mode == "auto":
        fused_ok = _fused_vmem_bytes(tb, in_size, hidden, out_pad,
                                     num_layers) <= 16 * 1024 * 1024
        mode = "fused" if fused_ok else "stream"
    assert mode in ("fused", "stream")

    flops = 2 * B * (in_size * hidden
                     + num_layers * hidden * hidden
                     + hidden * out_pad)
    transcendentals = B * hidden * (num_layers + 1)

    if mode == "fused":
        kernel = functools.partial(_res_net_fused_kernel,
                                   num_layers=num_layers, split=split)
        grid_spec = pltpu.PrefetchScalarGridSpec(
            num_scalar_prefetch=0,
            grid=(B // tb,),
            in_specs=[
                pl.BlockSpec((tb, in_size), lambda i: (i, 0)),                   # x
                pl.BlockSpec((in_size, hidden), lambda i: (0, 0)),               # w_in
                pl.BlockSpec((1, hidden), lambda i: (0, 0)),                     # b_in
                pl.BlockSpec((num_layers, hidden, hidden), lambda i: (0, 0, 0)),  # w_hid
                pl.BlockSpec((num_layers, 1, hidden), lambda i: (0, 0, 0)),      # b_hid
                pl.BlockSpec((hidden, out_pad), lambda i: (0, 0)),               # w_out
                pl.BlockSpec((1, out_pad), lambda i: (0, 0)),                    # b_out
            ],
            out_specs=pl.BlockSpec((tb, out_pad), lambda i: (i, 0)),
            scratch_shapes=[],
        )
        dim_sem = ("parallel",)
        # Weights DMA'd once (constant index map); activations once per tile.
        bytes_accessed = int(
            x_bf.size * 2 + w_in_bf.size * 2 + w_hid_bf.size * 2
            + w_out_bf.size * 2
            + (b_in.size + b_hid.size + b_out_p.size) * 4
            + B * out_pad * 4)
    else:
        kernel = functools.partial(_res_net_stream_kernel, split=split)
        grid_spec = pltpu.PrefetchScalarGridSpec(
            num_scalar_prefetch=0,
            grid=(B // tb, num_layers),
            in_specs=[
                pl.BlockSpec((tb, in_size), lambda i, l: (i, 0)),              # x
                pl.BlockSpec((in_size, hidden), lambda i, l: (0, 0)),          # w_in
                pl.BlockSpec((1, hidden), lambda i, l: (0, 0)),                # b_in
                pl.BlockSpec((1, hidden, hidden), lambda i, l: (l, 0, 0)),     # w_hid[l]
                pl.BlockSpec((1, 1, hidden), lambda i, l: (l, 0, 0)),          # b_hid[l]
                pl.BlockSpec((hidden, out_pad), lambda i, l: (0, 0)),          # w_out
                pl.BlockSpec((1, out_pad), lambda i, l: (0, 0)),               # b_out
            ],
            out_specs=pl.BlockSpec((tb, out_pad), lambda i, l: (i, 0)),
            scratch_shapes=[pltpu.VMEM((tb, hidden), jnp.float32)],            # h
        )
        dim_sem = ("parallel", "arbitrary")
        # Hidden-weight slabs are re-fetched once per batch tile.
        bytes_accessed = int(
            x_bf.size * 2 + w_in_bf.size * 2
            + w_hid_bf.size * 2 * (B // tb) + w_out_bf.size * 2
            + (b_in.size + b_hid.size * (B // tb) + b_out_p.size) * 4
            + B * out_pad * 4)

    out_padded = pl.pallas_call(
        kernel,
        out_shape=jax.ShapeDtypeStruct((B, out_pad), jnp.float32),
        grid_spec=grid_spec,
        compiler_params=pltpu.CompilerParams(
            dimension_semantics=dim_sem,
            vmem_limit_bytes=vmem_limit_bytes),
        cost_estimate=pl.CostEstimate(
            flops=int(flops),
            transcendentals=int(transcendentals),
            bytes_accessed=bytes_accessed),
    )(x_bf, w_in_bf, b_in, w_hid_bf, b_hid, w_out_bf, b_out_p)

    return out_padded[:, :out_size]


# ----------------------------------------------------------------------------
# Params / reference
# ----------------------------------------------------------------------------
def init_params(key, input_size, hidden_size, num_hidden_layers, output_size):
    """Deterministic init mimicking nn.Linear U(-1/sqrt(fan_in), 1/sqrt(fan_in)).

    Weights stored pre-transposed as (in_features, out_features)."""
    ks = jax.random.split(key, 6)

    def lin(kw, kb, fan_in, fan_out):
        bound = 1.0 / jnp.sqrt(fan_in)
        w = jax.random.uniform(kw, (fan_in, fan_out), jnp.float32, -bound, bound)
        b = jax.random.uniform(kb, (1, fan_out), jnp.float32, -bound, bound)
        return w, b

    w_in, b_in = lin(ks[0], ks[1], input_size, hidden_size)

    kw_h = jax.random.split(ks[2], num_hidden_layers)
    kb_h = jax.random.split(ks[3], num_hidden_layers)
    hid = [lin(kw_h[l], kb_h[l], hidden_size, hidden_size)
           for l in range(num_hidden_layers)]
    w_hid = jnp.stack([w for w, _ in hid])
    b_hid = jnp.stack([b for _, b in hid])

    w_out, b_out = lin(ks[4], ks[5], hidden_size, output_size)
    return dict(w_in=w_in, b_in=b_in, w_hid=w_hid, b_hid=b_hid,
                w_out=w_out, b_out=b_out)


def res_net_reference(x, params):
    """Pure-JAX f32 reference matching the PyTorch forward exactly."""
    h = jnp.tanh(x @ params["w_in"] + params["b_in"])
    for l in range(params["w_hid"].shape[0]):
        h = h + jnp.tanh(h @ params["w_hid"][l] + params["b_hid"][l])
    return h @ params["w_out"] + params["b_out"]


if __name__ == "__main__":
    # Small shapes consistent with the module: batch=64, input=16, hidden=32,
    # 3 hidden layers, output=4, activation=tanh. Batch of 64 with the default
    # tile (32) gives a 2-step "parallel" batch grid (exercises pipelining /
    # megacore sharding) while staying small.
    B, INPUT, HIDDEN, LAYERS, OUTPUT = 64, 16, 32, 3, 4

    key = jax.random.PRNGKey(0)
    k_x, k_p = jax.random.split(key)
    x = jax.random.normal(k_x, (B, INPUT), jnp.float32)
    params = init_params(k_p, INPUT, HIDDEN, LAYERS, OUTPUT)

    ref = res_net_reference(x, params)

    # Exercise both execution modes ("auto" picks "fused" at these shapes).
    out_fused = jax.block_until_ready(res_net_forward(x, params, mode="fused"))
    out_stream = jax.block_until_ready(res_net_forward(x, params, mode="stream"))

    assert out_fused.shape == (B, OUTPUT)
    assert out_stream.shape == (B, OUTPUT)
    # Looser tolerance than pure f32: MXU operands are bf16 (f32 accumulate).
    assert jnp.allclose(out_fused, ref, atol=5e-2, rtol=5e-2), "fused mismatch"
    assert jnp.allclose(out_stream, ref, atol=5e-2, rtol=5e-2), "stream mismatch"

    print("KERNEL_OK")
</pallas_src>

<mosaic_0001>
module attributes {stable_mosaic.version = 11 : i64} {
  func.func @_res_net_fused_kernel(%arg0: i32, %arg1: memref<32x16xbf16, #tpu.memory_space<vmem>>, %arg2: memref<16x32xbf16, #tpu.memory_space<vmem>>, %arg3: memref<1x32xf32, #tpu.memory_space<vmem>>, %arg4: memref<3x32x32xbf16, #tpu.memory_space<vmem>>, %arg5: memref<3x1x32xf32, #tpu.memory_space<vmem>>, %arg6: memref<32x128xbf16, #tpu.memory_space<vmem>>, %arg7: memref<1x128xf32, #tpu.memory_space<vmem>>, %arg8: memref<32x128xf32, #tpu.memory_space<vmem>>) attributes {dimension_semantics = [#tpu.dimension_semantics<parallel>], iteration_bounds = array<i64: 2>, scalar_prefetch = 0 : i64, scratch_operands = 0 : i64, tpu.core_type = #tpu.core_type<tc>, window_params = [{transform_indices = @transform_0, window_bounds = array<i64: 32, 16>}, {pipeline_mode = #tpu.pipeline_mode<synchronous>, transform_indices = @transform_1, window_bounds = array<i64: 16, 32>}, {pipeline_mode = #tpu.pipeline_mode<synchronous>, transform_indices = @transform_2, window_bounds = array<i64: 1, 32>}, {pipeline_mode = #tpu.pipeline_mode<synchronous>, transform_indices = @transform_3, window_bounds = array<i64: 3, 32, 32>}, {pipeline_mode = #tpu.pipeline_mode<synchronous>, transform_indices = @transform_4, window_bounds = array<i64: 3, 1, 32>}, {pipeline_mode = #tpu.pipeline_mode<synchronous>, transform_indices = @transform_5, window_bounds = array<i64: 32, 128>}, {pipeline_mode = #tpu.pipeline_mode<synchronous>, transform_indices = @transform_6, window_bounds = array<i64: 1, 128>}, {transform_indices = @transform_7, window_bounds = array<i64: 32, 128>}]} {
    %c0 = arith.constant 0 : index
    %c0_0 = arith.constant 0 : index
    %0 = vector.load %arg2[%c0, %c0_0] : memref<16x32xbf16, #tpu.memory_space<vmem>>, vector<16x32xbf16>
    %c0_1 = arith.constant 0 : index
    %c0_2 = arith.constant 0 : index
    %1 = vector.load %arg3[%c0_1, %c0_2] : memref<1x32xf32, #tpu.memory_space<vmem>>, vector<1x32xf32>
    %c0_3 = arith.constant 0 : index
    %c0_4 = arith.constant 0 : index
    %2 = vector.load %arg6[%c0_3, %c0_4] : memref<32x128xbf16, #tpu.memory_space<vmem>>, vector<32x128xbf16>
    %c0_5 = arith.constant 0 : index
    %c0_6 = arith.constant 0 : index
    %3 = vector.load %arg7[%c0_5, %c0_6] : memref<1x128xf32, #tpu.memory_space<vmem>>, vector<1x128xf32>
    %c0_7 = arith.constant 0 : index
    %c0_8 = arith.constant 0 : index
    %4 = vector.load %arg1[%c0_7, %c0_8] : memref<32x16xbf16, #tpu.memory_space<vmem>>, vector<16x16xbf16>
    %cst = arith.constant dense<0.000000e+00> : vector<16x32xf32>
    %5 = tpu.matmul %4, %0, %cst {dimension_numbers = #tpu.dot_dimension_numbers<[1], [0], [0], [1], [0, 0, 1, 1], [], []>} : vector<16x16xbf16>, vector<16x32xbf16>, vector<16x32xf32> -> vector<16x32xf32>
    %6 = vector.broadcast %1 : vector<1x32xf32> to vector<16x32xf32>
    %7 = arith.addf %5, %6 : vector<16x32xf32>
    %8 = math.tanh %7 : vector<16x32xf32>
    %c0_9 = arith.constant 0 : index
    %c0_10 = arith.constant 0 : index
    %c0_11 = arith.constant 0 : index
    %9 = vector.load %arg4[%c0_9, %c0_10, %c0_11] : memref<3x32x32xbf16, #tpu.memory_space<vmem>>, vector<1x32x32xbf16>
    %10 = vector.shape_cast %9 : vector<1x32x32xbf16> to vector<32x32xbf16>
    %c0_12 = arith.constant 0 : index
    %c0_13 = arith.constant 0 : index
    %c0_14 = arith.constant 0 : index
    %11 = vector.load %arg5[%c0_12, %c0_13, %c0_14] : memref<3x1x32xf32, #tpu.memory_space<vmem>>, vector<1x1x32xf32>
    %12 = vector.shape_cast %11 : vector<1x1x32xf32> to vector<1x32xf32>
    %13 = arith.truncf %8 : vector<16x32xf32> to vector<16x32xbf16>
    %cst_15 = arith.constant dense<0.000000e+00> : vector<16x32xf32>
    %14 = tpu.matmul %13, %10, %cst_15 {dimension_numbers = #tpu.dot_dimension_numbers<[1], [0], [0], [1], [0, 0, 1, 1], [], []>} : vector<16x32xbf16>, vector<32x32xbf16>, vector<16x32xf32> -> vector<16x32xf32>
    %15 = vector.broadcast %12 : vector<1x32xf32> to vector<16x32xf32>
    %16 = arith.addf %14, %15 : vector<16x32xf32>
    %17 = math.tanh %16 : vector<16x32xf32>
    %18 = arith.addf %8, %17 : vector<16x32xf32>
    %c1 = arith.constant 1 : index
    %c0_16 = arith.constant 0 : index
    %c0_17 = arith.constant 0 : index
    %19 = vector.load %arg4[%c1, %c0_16, %c0_17] : memref<3x32x32xbf16, #tpu.memory_space<vmem>>, vector<1x32x32xbf16>
    %20 = vector.shape_cast %19 : vector<1x32x32xbf16> to vector<32x32xbf16>
    %c1_18 = arith.constant 1 : index
    %c0_19 = arith.constant 0 : index
    %c0_20 = arith.constant 0 : index
    %21 = vector.load %arg5[%c1_18, %c0_19, %c0_20] : memref<3x1x32xf32, #tpu.memory_space<vmem>>, vector<1x1x32xf32>
    %22 = vector.shape_cast %21 : vector<1x1x32xf32> to vector<1x32xf32>
    %23 = arith.truncf %18 : vector<16x32xf32> to vector<16x32xbf16>
    %cst_21 = arith.constant dense<0.000000e+00> : vector<16x32xf32>
    %24 = tpu.matmul %23, %20, %cst_21 {dimension_numbers = #tpu.dot_dimension_numbers<[1], [0], [0], [1], [0, 0, 1, 1], [], []>} : vector<16x32xbf16>, vector<32x32xbf16>, vector<16x32xf32> -> vector<16x32xf32>
    %25 = vector.broadcast %22 : vector<1x32xf32> to vector<16x32xf32>
    %26 = arith.addf %24, %25 : vector<16x32xf32>
    %27 = math.tanh %26 : vector<16x32xf32>
    %28 = arith.addf %18, %27 : vector<16x32xf32>
    %c2 = arith.constant 2 : index
    %c0_22 = arith.constant 0 : index
    %c0_23 = arith.constant 0 : index
    %29 = vector.load %arg4[%c2, %c0_22, %c0_23] : memref<3x32x32xbf16, #tpu.memory_space<vmem>>, vector<1x32x32xbf16>
    %30 = vector.shape_cast %29 : vector<1x32x32xbf16> to vector<32x32xbf16>
    %c2_24 = arith.constant 2 : index
    %c0_25 = arith.constant 0 : index
    %c0_26 = arith.constant 0 : index
    %31 = vector.load %arg5[%c2_24, %c0_25, %c0_26] : memref<3x1x32xf32, #tpu.memory_space<vmem>>, vector<1x1x32xf32>
    %32 = vector.shape_cast %31 : vector<1x1x32xf32> to vector<1x32xf32>
    %33 = arith.truncf %28 : vector<16x32xf32> to vector<16x32xbf16>
    %cst_27 = arith.constant dense<0.000000e+00> : vector<16x32xf32>
    %34 = tpu.matmul %33, %30, %cst_27 {dimension_numbers = #tpu.dot_dimension_numbers<[1], [0], [0], [1], [0, 0, 1, 1], [], []>} : vector<16x32xbf16>, vector<32x32xbf16>, vector<16x32xf32> -> vector<16x32xf32>
    %35 = vector.broadcast %32 : vector<1x32xf32> to vector<16x32xf32>
    %36 = arith.addf %34, %35 : vector<16x32xf32>
    %37 = math.tanh %36 : vector<16x32xf32>
    %38 = arith.addf %28, %37 : vector<16x32xf32>
    %39 = arith.truncf %38 : vector<16x32xf32> to vector<16x32xbf16>
    %cst_28 = arith.constant dense<0.000000e+00> : vector<16x128xf32>
    %40 = tpu.matmul %39, %2, %cst_28 {dimension_numbers = #tpu.dot_dimension_numbers<[1], [0], [0], [1], [0, 0, 1, 1], [], []>} : vector<16x32xbf16>, vector<32x128xbf16>, vector<16x128xf32> -> vector<16x128xf32>
    %41 = vector.broadcast %3 : vector<1x128xf32> to vector<16x128xf32>
    %42 = arith.addf %40, %41 : vector<16x128xf32>
    %c0_29 = arith.constant 0 : index
    %c0_30 = arith.constant 0 : index
    %43 = vector.load %arg8[%c0_29, %c0_30] : memref<32x128xf32, #tpu.memory_space<vmem>>, vector<16x128xf32>
    tpu.vector_store %arg8[%c0_29, %c0_30], %42 {strides = array<i32>} : memref<32x128xf32, #tpu.memory_space<vmem>>, vector<16x128xf32>,
    %c16 = arith.constant 16 : index
    %c0_31 = arith.constant 0 : index
    %44 = vector.load %arg1[%c16, %c0_31] : memref<32x16xbf16, #tpu.memory_space<vmem>>, vector<16x16xbf16>
    %cst_32 = arith.constant dense<0.000000e+00> : vector<16x32xf32>
    %45 = tpu.matmul %44, %0, %cst_32 {dimension_numbers = #tpu.dot_dimension_numbers<[1], [0], [0], [1], [0, 0, 1, 1], [], []>} : vector<16x16xbf16>, vector<16x32xbf16>, vector<16x32xf32> -> vector<16x32xf32>
    %46 = vector.broadcast %1 : vector<1x32xf32> to vector<16x32xf32>
    %47 = arith.addf %45, %46 : vector<16x32xf32>
    %48 = math.tanh %47 : vector<16x32xf32>
    %c0_33 = arith.constant 0 : index
    %c0_34 = arith.constant 0 : index
    %c0_35 = arith.constant 0 : index
    %49 = vector.load %arg4[%c0_33, %c0_34, %c0_35] : memref<3x32x32xbf16, #tpu.memory_space<vmem>>, vector<1x32x32xbf16>
    %50 = vector.shape_cast %49 : vector<1x32x32xbf16> to vector<32x32xbf16>
    %c0_36 = arith.constant 0 : index
    %c0_37 = arith.constant 0 : index
    %c0_38 = arith.constant 0 : index
    %51 = vector.load %arg5[%c0_36, %c0_37, %c0_38] : memref<3x1x32xf32, #tpu.memory_space<vmem>>, vector<1x1x32xf32>
    %52 = vector.shape_cast %51 : vector<1x1x32xf32> to vector<1x32xf32>
    %53 = arith.truncf %48 : vector<16x32xf32> to vector<16x32xbf16>
    %cst_39 = arith.constant dense<0.000000e+00> : vector<16x32xf32>
    %54 = tpu.matmul %53, %50, %cst_39 {dimension_numbers = #tpu.dot_dimension_numbers<[1], [0], [0], [1], [0, 0, 1, 1], [], []>} : vector<16x32xbf16>, vector<32x32xbf16>, vector<16x32xf32> -> vector<16x32xf32>
    %55 = vector.broadcast %52 : vector<1x32xf32> to vector<16x32xf32>
    %56 = arith.addf %54, %55 : vector<16x32xf32>
    %57 = math.tanh %56 : vector<16x32xf32>
    %58 = arith.addf %48, %57 : vector<16x32xf32>
    %c1_40 = arith.constant 1 : index
    %c0_41 = arith.constant 0 : index
    %c0_42 = arith.constant 0 : index
    %59 = vector.load %arg4[%c1_40, %c0_41, %c0_42] : memref<3x32x32xbf16, #tpu.memory_space<vmem>>, vector<1x32x32xbf16>
    %60 = vector.shape_cast %59 : vector<1x32x32xbf16> to vector<32x32xbf16>
    %c1_43 = arith.constant 1 : index
    %c0_44 = arith.constant 0 : index
    %c0_45 = arith.constant 0 : index
    %61 = vector.load %arg5[%c1_43, %c0_44, %c0_45] : memref<3x1x32xf32, #tpu.memory_space<vmem>>, vector<1x1x32xf32>
    %62 = vector.shape_cast %61 : vector<1x1x32xf32> to vector<1x32xf32>
    %63 = arith.truncf %58 : vector<16x32xf32> to vector<16x32xbf16>
    %cst_46 = arith.constant dense<0.000000e+00> : vector<16x32xf32>
    %64 = tpu.matmul %63, %60, %cst_46 {dimension_numbers = #tpu.dot_dimension_numbers<[1], [0], [0], [1], [0, 0, 1, 1], [], []>} : vector<16x32xbf16>, vector<32x32xbf16>, vector<16x32xf32> -> vector<16x32xf32>
    %65 = vector.broadcast %62 : vector<1x32xf32> to vector<16x32xf32>
    %66 = arith.addf %64, %65 : vector<16x32xf32>
    %67 = math.tanh %66 : vector<16x32xf32>
    %68 = arith.addf %58, %67 : vector<16x32xf32>
    %c2_47 = arith.constant 2 : index
    %c0_48 = arith.constant 0 : index
    %c0_49 = arith.constant 0 : index
    %69 = vector.load %arg4[%c2_47, %c0_48, %c0_49] : memref<3x32x32xbf16, #tpu.memory_space<vmem>>, vector<1x32x32xbf16>
    %70 = vector.shape_cast %69 : vector<1x32x32xbf16> to vector<32x32xbf16>
    %c2_50 = arith.constant 2 : index
    %c0_51 = arith.constant 0 : index
    %c0_52 = arith.constant 0 : index
    %71 = vector.load %arg5[%c2_50, %c0_51, %c0_52] : memref<3x1x32xf32, #tpu.memory_space<vmem>>, vector<1x1x32xf32>
    %72 = vector.shape_cast %71 : vector<1x1x32xf32> to vector<1x32xf32>
    %73 = arith.truncf %68 : vector<16x32xf32> to vector<16x32xbf16>
    %cst_53 = arith.constant dense<0.000000e+00> : vector<16x32xf32>
    %74 = tpu.matmul %73, %70, %cst_53 {dimension_numbers = #tpu.dot_dimension_numbers<[1], [0], [0], [1], [0, 0, 1, 1], [], []>} : vector<16x32xbf16>, vector<32x32xbf16>, vector<16x32xf32> -> vector<16x32xf32>
    %75 = vector.broadcast %72 : vector<1x32xf32> to vector<16x32xf32>
    %76 = arith.addf %74, %75 : vector<16x32xf32>
    %77 = math.tanh %76 : vector<16x32xf32>
    %78 = arith.addf %68, %77 : vector<16x32xf32>
    %79 = arith.truncf %78 : vector<16x32xf32> to vector<16x32xbf16>
    %cst_54 = arith.constant dense<0.000000e+00> : vector<16x128xf32>
    %80 = tpu.matmul %79, %2, %cst_54 {dimension_numbers = #tpu.dot_dimension_numbers<[1], [0], [0], [1], [0, 0, 1, 1], [], []>} : vector<16x32xbf16>, vector<32x128xbf16>, vector<16x128xf32> -> vector<16x128xf32>
    %81 = vector.broadcast %3 : vector<1x128xf32> to vector<16x128xf32>
    %82 = arith.addf %80, %81 : vector<16x128xf32>
    %c16_55 = arith.constant 16 : index
    %c0_56 = arith.constant 0 : index
    %83 = vector.load %arg8[%c16_55, %c0_56] : memref<32x128xf32, #tpu.memory_space<vmem>>, vector<16x128xf32>
    tpu.vector_store %arg8[%c16_55, %c0_56], %82 {strides = array<i32>} : memref<32x128xf32, #tpu.memory_space<vmem>>, vector<16x128xf32>,
    return
  }
  func.func @transform_0(%arg0: i32) -> (i32, i32) {
    %c0_i32 = arith.constant 0 : i32
    %c0_i32_0 = arith.constant 0 : i32
    return %arg0, %c0_i32 : i32, i32
  }
  func.func @transform_1(%arg0: i32) -> (i32, i32) {
    %c0_i32 = arith.constant 0 : i32
    %c0_i32_0 = arith.constant 0 : i32
    %c0_i32_1 = arith.constant 0 : i32
    return %c0_i32, %c0_i32_0 : i32, i32
  }
  func.func @transform_2(%arg0: i32) -> (i32, i32) {
    %c0_i32 = arith.constant 0 : i32
    %c0_i32_0 = arith.constant 0 : i32
    %c0_i32_1 = arith.constant 0 : i32
    return %c0_i32, %c0_i32_0 : i32, i32
  }
  func.func @transform_3(%arg0: i32) -> (i32, i32, i32) {
    %c0_i32 = arith.constant 0 : i32
    %c0_i32_0 = arith.constant 0 : i32
    %c0_i32_1 = arith.constant 0 : i32
    %c0_i32_2 = arith.constant 0 : i32
    return %c0_i32, %c0_i32_0, %c0_i32_1 : i32, i32, i32
  }
  func.func @transform_4(%arg0: i32) -> (i32, i32, i32) {
    %c0_i32 = arith.constant 0 : i32
    %c0_i32_0 = arith.constant 0 : i32
    %c0_i32_1 = arith.constant 0 : i32
    %c0_i32_2 = arith.constant 0 : i32
    return %c0_i32, %c0_i32_0, %c0_i32_1 : i32, i32, i32
  }
  func.func @transform_5(%arg0: i32) -> (i32, i32) {
    %c0_i32 = arith.constant 0 : i32
    %c0_i32_0 = arith.constant 0 : i32
    %c0_i32_1 = arith.constant 0 : i32
    return %c0_i32, %c0_i32_0 : i32, i32
  }
  func.func @transform_6(%arg0: i32) -> (i32, i32) {
    %c0_i32 = arith.constant 0 : i32
    %c0_i32_0 = arith.constant 0 : i32
    %c0_i32_1 = arith.constant 0 : i32
    return %c0_i32, %c0_i32_0 : i32, i32
  }
  func.func @transform_7(%arg0: i32) -> (i32, i32) {
    %c0_i32 = arith.constant 0 : i32
    %c0_i32_0 = arith.constant 0 : i32
    return %arg0, %c0_i32 : i32, i32
  }
}

</mosaic_0001>

<bundles_post_ra>
// kernel: tpu_custom_call.1
= control target key start
LH: loop header
LB: loop body
LE: loop exit
PB: predicated region body
PF: predicated region fallthrough
CT: control target
= control target key end

     0   :  { %s1963_s0 = inlined_call_operand.vmem [shape: bf16[64,16], index: 0, kind: input, shape index: {}]   ;;  %s1964_s1 = inlined_call_operand.hbm [shape: bf16[16,32], index: 1, kind: input, shape index: {}]   ;;  %s1965_s2 = inlined_call_operand.hbm [shape: f32[1,32], index: 2, kind: input, shape index: {}]   ;;  %s1966_s3 = inlined_call_operand.vmem [shape: bf16[3,32,32], index: 3, kind: input, shape index: {}]   ;;  %s1967_s4 = inlined_call_operand.vmem [shape: f32[3,1,32], index: 4, kind: input, shape index: {}]   ;;  %s1968_s5 = inlined_call_operand.hbm [shape: bf16[32,128], index: 5, kind: input, shape index: {}]   ;;  %s1969_s6 = inlined_call_operand.vmem [shape: f32[1,128], index: 6, kind: input, shape index: {}]   ;;  %s1970_s7 = inlined_call_operand.hbm [shape: f32[64,128], index: 7, kind: output, shape index: {}]  }
   0x1   :  { %1974 = sst [smem:[#allocation13_spill]] %s1965_s2 }
   0x2   :  { %12 = vsyncpa [#allocation3], 0 }
   0x3   :  { %13 = vsyncpa [#allocation6], 0 }
   0x4   :  { %14 = vsyncpa [#allocation4], 0 }
   0x5   :  { %16 = vsyncpa [#allocation4 + $0x1], 0  ;;  %s1615_s24 = smov 0   ;;  %s1617_s25 = smov 0  }
   0x6   :  { %s1619_s26 = smov 0   ;;  %s1621_s27 = smov 0  }
   0x7 LB: > { %s1636_s28 = sadd.s32 4294967295, %s1563_s27   ;;  %s1106_s29 = sadd.s32 4294967294, %s1563_s27   ;;  %s1563_s27 = sphi %s1621_s27, %s1993_s27   ;;  %s1559_s26 = sphi %s1619_s26, %s1992_s26   ;;  %s1555_s25 = sphi %s1617_s25, %s1991_s25   ;;  %s1551_s24 = sphi %s1615_s24, %s1990_s24  }
   0x8   : > { %s1640_s30 = sadd.s32 1, %s1563_s27   ;;  %s181_s8 = sadd.s32 1, %s1559_s26 }
   0x9   : > { %s178_s9 = ssub.s32 %s1563_s27, %s1640_s30  ;;  %p191_p0 = scmp.ne.s32.totalorder %s1559_s26, %s1555_s25 }
   0xa   : > { %p179_p1 = scmp.eq.s32.totalorder %s178_s9, 0  ;;  %p192_p2 = scmp.eq.s32.totalorder %s1636_s28, 1 }
   0xb   : > { %p197_p3 = scmp.ne.s32.totalorder %s1555_s25, %s1551_s24  ;;  %p198_p4 = scmp.eq.s32.totalorder %s1106_s29, 1 }
   0xc   : > { %s1651_s10 = scalar_select %p179_p1, %s1559_s26, %s181_s8  }
   0xd   : > { %p1653_p5 = por %p192_p2, %p191_p0  ;;  %p1657_p6 = por %p198_p4, %p197_p3 }
   0xe   : > { %1975 = sst [smem:[#allocation12_spill]] %s1651_s10  ;;  %p1107_p7 = scmp.ge.s32.totalorder %s1563_s27, 1 }
   0xf   : > { %s1976_s11 = scalar_select %p1653_p5, 1, 0 }
  0x10   : > { %s1977_s12 = scalar_select %p1657_p6, 1, 0 }
  0x11   : > { %p205_p8 = scmp.lt.s32.totalorder %s1563_s27, 3  ;;  %p1971_p9 = scmp.eq.s32.totalorder %s1636_s28, 0 }
  0x12   : > { %s1565_s14 = smov [#allocation5]   ;;  %s1566_s16 = smov [#allocation2]  }
  0x13   : > { %p1664_p10 = pnand %p1107_p7, %p205_p8  ;;  %s231_s15 = sshll.u32 %s1565_s14, 4  ;;  %s232_s15 = int_to_ptr.vmem [resolvable:$true] %s231_s15 }
  0x14   : > { %s217_s17 = sshll.u32 %s1566_s16, 4  ;;  %s1567_s19 = smov [#allocation7]   ;;  %s1676_s17 = int_to_ptr.vmem [resolvable:$true] %s217_s17 }
  0x15   : > { %s1978_s13 = scalar_select %p1664_p10, 1, 0 }
  0x16   : > { %p1298_p11 = pneg %p1664_p10  ;;  %s1678_s20 = sshll.u32 %s1567_s19, 4  ;;  %s248_s20 = int_to_ptr.vmem [resolvable:$true] %s1678_s20 }
  0x17   : > { %s1980_s2 = sld [smem:[#allocation13_spill]] }
  0x18   : > { %p1672_p12 = pnand %p1971_p9, %p1298_p11 }
  0x1a   : > { %p1688_p0 = pneg %p1672_p12 }
  0x1d   : > { %s1409_s23 = scalar_lea.hbm %s1980_s2, 16 }
  0x1e   : > { %p1410_p13 = scmp.ne.s32.totalorder %s1980_s2, %s1409_s23  ;;  %p1416_p3 = scmp.lt.u32.totalorder %s1409_s23, %s1980_s2 }
  0x20   : > { %p1412_p1 = pnand %p1688_p0, %p1410_p13 }
  0x22   : > { %p1413_p2 = pneg %p1412_p1 }
  0x24   : > { %p1418_p4 = pnand %p1416_p3, %p1413_p2 }
  0x26   : > { %1421 = shalt.err (!%p1418_p4)
}
  0x27   : > { %s1422_s19 = scalar_lea.vmem %s232_s15, 16  ;;  %s1429_s21 = scalar_lea.vmem %s232_s15, 32 }
  0x28   : > { %p1423_p7 = scmp.ne.s32.totalorder %s232_s15, %s1422_s19  ;;  %p1430_p9 = scmp.lt.s32.totalorder %s232_s15, %s232_s15 }
  0x29   : > { %p1431_p6 = scmp.lt.s32.totalorder %s1429_s21, %s1422_s19 }
  0x2a   : > { %p1425_p8 = pnand %p1423_p7, %p1688_p0 }
  0x2b   : > { %p1432_p5 = por %p1431_p6, %p1430_p9 }
  0x2c   : > { %p1426_p11 = pneg %p1425_p8 }
  0x2e   : > { %p1433_p10 = pnand %p1432_p5, %p1426_p11 }
  0x30   : > { %1436 = shalt.err (!%p1433_p10)
}
  0x31   : > { %1304 = dma.hbm_to_vmem [thread:$0]  (!%p1672_p12), %s1980_s2, 16, %s232_s15, [#allocation6]  }
  0x32   : > { %s1437_s14 = scalar_lea.hbm %s1964_s1, 128 }
  0x33   : > { %p1438_p13 = scmp.ne.s32.totalorder %s1964_s1, %s1437_s14  ;;  %p1444_p5 = scmp.lt.u32.totalorder %s1437_s14, %s1964_s1 }
  0x35   : > { %p1440_p1 = pnand %p1438_p13, %p1688_p0 }
  0x37   : > { %p1441_p6 = pneg %p1440_p1 }
  0x39   : > { %p1446_p9 = pnand %p1444_p5, %p1441_p6 }
  0x3b   : > { %1449 = shalt.err (!%p1446_p9)
}
  0x3c   : > { %s1450_s15 = scalar_lea.vmem %s1676_s17, 128  ;;  %p1458_p4 = scmp.lt.s32.totalorder %s1676_s17, %s1676_s17 }
  0x3d   : > { %p1451_p10 = scmp.ne.s32.totalorder %s1676_s17, %s1450_s15  ;;  %p1459_p7 = scmp.lt.s32.totalorder %s1450_s15, %s1450_s15 }
  0x3f   : > { %p1453_p2 = pnand %p1451_p10, %p1688_p0  ;;  %p1460_p8 = por %p1459_p7, %p1458_p4 }
  0x41   : > { %p1454_p3 = pneg %p1453_p2 }
  0x43   : > { %p1461_p11 = pnand %p1460_p8, %p1454_p3 }
  0x45   : > { %1464 = shalt.err (!%p1461_p11)
}
  0x46   : > { %s1568_s10 = smov 64   ;;  %s1569_s22 = smov 4  }
  0x47   : > { %1301 = dma.hbm_to_vmem [thread:$0]  (!%p1672_p12), %s1964_s1, 128, %s1676_s17, [#allocation3], %s1568_s10, %s1568_s10, %s1569_s22  }
  0x48   : > { %s1465_s16 = scalar_lea.hbm %s1968_s5, 256 }
  0x49   : > { %p1466_p13 = scmp.ne.s32.totalorder %s1968_s5, %s1465_s16  ;;  %p1472_p5 = scmp.lt.u32.totalorder %s1465_s16, %s1968_s5 }
  0x4b   : > { %p1468_p1 = pnand %p1466_p13, %p1688_p0 }
  0x4d   : > { %p1469_p6 = pneg %p1468_p1 }
  0x4f   : > { %p1474_p9 = pnand %p1472_p5, %p1469_p6 }
  0x51   : > { %1477 = shalt.err (!%p1474_p9)
}
  0x52   : > { %s1478_s29 = scalar_lea.vmem %s248_s20, 256  ;;  %p1486_p4 = scmp.lt.s32.totalorder %s248_s20, %s248_s20 }
  0x53   : > { %p1479_p10 = scmp.ne.s32.totalorder %s248_s20, %s1478_s29  ;;  %p1487_p7 = scmp.lt.s32.totalorder %s1478_s29, %s1478_s29 }
  0x55   : > { %p1481_p2 = pnand %p1479_p10, %p1688_p0  ;;  %p1488_p8 = por %p1487_p7, %p1486_p4 }
  0x57   : > { %p1482_p3 = pneg %p1481_p2 }
  0x59   : > { %p1489_p11 = pnand %p1488_p8, %p1482_p3 }
  0x5b   : > { %1492 = shalt.err (!%p1489_p11)
}
  0x5c   : > { %1307 = dma.hbm_to_vmem [thread:$0]  (!%p1672_p12), %s1968_s5, 256, %s248_s20, [#allocation6], %s1568_s10, %s1568_s10, %s1569_s22  }
  0x5d   : > { %p1982_p13 = scmp.ne.s32.totalorder %s1978_s13, 0 }
  0x5e   : > { %p1983_p1 = scmp.eq.s32.totalorder (!%p1982_p13), %s1636_s28, 0 }
  0x5f   : > { %275 = sbr.rel (%p1982_p13) target bundleno = 1968 (0x7b0), region = 48 }
  0x66   : > { %1538 = dma.done.wait (%p1983_p1), [#allocation3], 128   ;;  %p1984_p0 = pmov %p1983_p1 }
  0x68   : > { %1540 = vsyncadd (%p1984_p0), [#allocation3], 4294967168  ;;  %p1985_p6 = pmov %p1984_p0 }
  0x69   : > { %p1986_p5 = pmov %p1984_p0 }
  0x6a   : > { %1542 = dma.done.wait (%p1985_p6), [#allocation6], 272  }
  0x6b   : > { %1544 = vsyncadd (%p1986_p5), [#allocation6], 4294967024  ;;  %s1117_s2 = sshll.u32 %s1636_s28, 2  ;;  %v1570_v0 = vmov 0.0   ;;  %vm1571_vm0 = vmmov 0   ;;  %v1768_v1 = vld [vmem:[#allocation2] sm:$0xff]  }
  0x6c   : > { %1208 = vmatprep.subr.bf16.mxu0 %v1570_v0  ;;  %1210 = vmatprep.mubr.msk.bf16.mxu0 %vm1571_vm0, %v1570_v0  ;;  %p316_p12 = scmp.lt.s32.totalorder %s1117_s2, 7  ;;  %vm350_vm1 = vcmask 130048   ;;  %v1362_v3 = vld [vmem:[%s1966_s3] sm:$0xff]   ;;  %v1363_v4 = vld [vmem:[%s1966_s3 + $0x8] sm:$0xff]   ;;  %v1784_v5 = vld [vmem:[#allocation5] ss:$0 sm:$0xff] }
  0x6d   : > { %1214 = vmatprep.subr.bf16.mxu1 %v1570_v0  ;;  %1218 = vmatprep.mubr.msk.bf16.mxu1 %vm1571_vm0, %v1570_v0  ;;  %vm421_vm2 = vcmask 261120   ;;  %v1364_v15 = vld [vmem:[%s1966_s3 + $0x10] sm:$0xff]   ;;  %v1365_v16 = vld [vmem:[%s1966_s3 + $0x18] sm:$0xff]   ;;  %v1802_v17 = vld [vmem:[%s1967_s4] ss:$0 sm:$0xff]  ;;  %s312_s23 = sand.u32 1, %s1555_s25  }
  0x6e   : > { %s1995_s2 = smov (!%p316_p12, %s1117_s2), 7  ;;  %1209 = vmatpush3.bf16.msra.mxu0 %v1768_v1  ;;  %1215 = vmatpush3.bf16.msra.mxu1 %v1362_v3  ;;  %v1366_v29 = vld [vmem:[%s1966_s3 + $0x20] sm:$0xff]   ;;  %v1367_v30 = vld [vmem:[%s1966_s3 + $0x28] sm:$0xff]   ;;  %s1179_s16 = sshll.u32 %s1636_s28, 9 }
  0x6f   : > { %s1118_s13 = sshll.u32 %s1995_s2, 2  ;;  %1222 = vmatprep.subr.bf16.mxu0 %v1570_v0  ;;  %1216 = vmatprep.subr.bf16.mxu1 %v1570_v0  ;;  %v1820_v31 = vld [vmem:[%s1967_s4 + $0x1] ss:$0 sm:$0xff]  ;;  %v1837_v45 = vld [vmem:[#allocation7 + $0x8] sm:$0xff]   ;;  %s1116_s2 = sshll.u32 %s312_s23, 5 }
  0x70   : > { %s1766_s9 = scalar_lea.vmem %s1963_s0, %s1118_s13  ;;  %v1833_v44 = vld [vmem:[#allocation7] sm:$0xff]   ;;  %v1844_v46 = vld [vmem:[%s1967_s4 + $0x2] ss:$0 sm:$0xff]  ;;  %s1881_s20 = scalar_lea.vmem [#allocation8], %s1116_s2 }
  0x71   : > { %v1361_v2 = vld [vmem:[%s1766_s9] sm:$0xff]   ;;  %v1368_v43 = vld [vmem:[%s1766_s9 + $0x8] sm:$0xff]   ;;  %s1013_s14 = sshll.u32 %s1881_s20, 4  ;;  %s1915_s15 = scalar_lea.hbm %s1970_s7, %s1179_s16  ;;  %s1910_s14 = int_to_ptr.vmem [resolvable:$true] %s1013_s14 }
  0x72   : > { %1211 = vmatmul.mubr.msk.bf16.vlgmr.msra.gmra.mrb[0].mxu0 %vm350_vm1, %v1361_v2  ;;  %1217 = vmatpush3.bf16.msra.mxu1 %v1363_v4  ;;  %v1371_v63 = vld [vmem:[%s1966_s3] sm:$0xff]   ;;  %v1372_v2 = vld [vmem:[%s1966_s3 + $0x8] sm:$0xff]   ;;  %s1922_s28 = scalar_lea.sflag [#allocation4], %s312_s23  ;;  %s1493_s29 = scalar_lea.vmem %s1910_s14, 512 }
  0x73   : > { %1226 = vmatprep.mubr.msk.bf16.mxu0 %vm1571_vm0, %v1570_v0  ;;  %1230 = vmatprep.subr.bf16.mxu1 %v1570_v0  ;;  %p1494_p9 = scmp.ne.s32.totalorder %s1910_s14, %s1493_s29  ;;  %p1987_p10 = scmp.ne.s32.totalorder %s1976_s11, 0 }
  0x74   : > { %1223 = vmatpush3.bf16.msra.mxu0 %v1364_v15  ;;  %s1572_s17 = smov [#allocation8]  }
  0x75   : > { %1224 = vmatprep.subr.bf16.mxu0 %v1570_v0  ;;  %p1495_p2 = pnand %p1494_p9, %p1987_p10  ;;  %s1497_s2 = sshll.u32 %s1572_s17, 4  ;;  %s1498_s2 = int_to_ptr.vmem [resolvable:$false] %s1497_s2 }
  0x76   : > { %s1499_s13 = scalar_lea.vmem %s1498_s2, 1024  ;;  %p1500_p4 = scmp.lt.s32.totalorder %s1910_s14, %s1498_s2 }
  0x77   : > { %p1496_p3 = pneg %p1495_p2  ;;  %p1501_p7 = scmp.lt.s32.totalorder %s1499_s13, %s1493_s29 }
  0x78   : > { %1225 = vmatpush3.bf16.msra.mxu0 %v1365_v16 }
  0x79   : > { %1238 = vmatprep.subr.bf16.mxu0 %v1570_v0  ;;  %p1502_p8 = por %p1501_p7, %p1500_p4 }
  0x7b   : > { %p1503_p11 = pnand %p1502_p8, %p1496_p3 }
 0x145   : > { %v388_v6 = vpop.f32.mrb[0].mxu0 }
 0x146   : > { %v389_v7 = vadd.f32 %v1784_v5, %v388_v6  ;;  %v1212_v8 = vpop.f32.mrb[1].mxu0  ;;  %v1373_v6 = vld [vmem:[%s1966_s3 + $0x10] sm:$0xff]  }
 0x147   : > { %v391_v9 = vpop.f32.mrb[2].mxu0  ;;  %v1878_v8 = vld [vmem:[%s1969_s6] ss:$0 sm:$0xff] }
 0x148   : > { %v392_v10 = vadd.f32 %v1784_v5, %v391_v9  ;;  %v1213_v11 = vpop.f32.mrb[3].mxu0  ;;  %1377 = vtanh.f32 %v389_v7  ;;  %v1374_v7 = vld [vmem:[%s1966_s3 + $0x18] sm:$0xff]  }
 0x14a   : > { %1379 = vtanh.f32 %v392_v10 }
 0x152   : > { %v1378_v12 = vpop.eup %1377 }
 0x154   : > { %v1380_v13 = vpop.eup %1379 }
 0x155   : > { %v402_v14 = vpack.c.bf16 %v1380_v13, %v1378_v12 }
 0x157   : > { %1219 = vmatmul.mubr.msk.bf16.vlgmr.msra.gmra.mrb[0].mxu1 %vm421_vm2, %v402_v14 }
 0x158   : > { %1234 = vmatprep.mubr.msk.bf16.mxu1 %vm1571_vm0, %v1570_v0  ;;  %1231 = vmatpush3.bf16.msra.mxu1 %v1366_v29 }
 0x159   : > { %1232 = vmatprep.subr.bf16.mxu1 %v1570_v0 }
 0x15c   : > { %1233 = vmatpush3.bf16.msra.mxu1 %v1367_v30 }
 0x15d   : > { %1246 = vmatprep.subr.bf16.mxu1 %v1570_v0 }
 0x22a   : > { %v459_v18 = vpop.f32.mrb[0].mxu1 }
 0x22b   : > { %v460_v19 = vadd.f32 %v1802_v17, %v459_v18  ;;  %v1220_v20 = vpop.f32.mrb[1].mxu1 }
 0x22c   : > { %v462_v21 = vpop.f32.mrb[2].mxu1 }
 0x22d   : > { %1381 = vtanh.f32 %v460_v19  ;;  %v463_v22 = vadd.f32 %v1802_v17, %v462_v21  ;;  %v1221_v23 = vpop.f32.mrb[3].mxu1 }
 0x22f   : > { %1383 = vtanh.f32 %v463_v22 }
 0x237   : > { %v1382_v24 = vpop.eup %1381 }
 0x238   : > { %v468_v26 = vadd.f32 %v1382_v24, %v1378_v12 }
 0x239   : > { %v1384_v25 = vpop.eup %1383 }
 0x23a   : > { %v469_v27 = vadd.f32 %v1384_v25, %v1380_v13 }
 0x23c   : > { %v477_v28 = vpack.c.bf16 %v469_v27, %v468_v26 }
 0x23e   : > { %1227 = vmatmul.mubr.msk.bf16.vlgmr.msra.gmra.mrb[4].mxu0 %vm421_vm2, %v477_v28 }
 0x23f   : > { %1242 = vmatprep.mubr.msk.bf16.mxu0 %vm1571_vm0, %v1570_v0  ;;  %1239 = vmatpush3.bf16.msra.mxu0 %v1833_v44 }
 0x240   : > { %1240 = vmatprep.subr.bf16.mxu0 %v1570_v0 }
 0x243   : > { %1241 = vmatpush3.bf16.msra.mxu0 %v1837_v45 }
 0x244   : > { %1252 = vmatprep.subr.bf16.mxu0 %v1570_v0 }
 0x311   : > { %v533_v32 = vpop.f32.mrb[4].mxu0 }
 0x312   : > { %v534_v33 = vadd.f32 %v1820_v31, %v533_v32  ;;  %v1228_v34 = vpop.f32.mrb[5].mxu0 }
 0x313   : > { %v536_v35 = vpop.f32.mrb[6].mxu0 }
 0x314   : > { %1385 = vtanh.f32 %v534_v33  ;;  %v537_v36 = vadd.f32 %v1820_v31, %v536_v35  ;;  %v1229_v37 = vpop.f32.mrb[7].mxu0 }
 0x316   : > { %1387 = vtanh.f32 %v537_v36 }
 0x31e   : > { %v1386_v38 = vpop.eup %1385 }
 0x31f   : > { %v542_v40 = vadd.f32 %v1386_v38, %v468_v26 }
 0x320   : > { %v1388_v39 = vpop.eup %1387 }
 0x321   : > { %v543_v41 = vadd.f32 %v1388_v39, %v469_v27  ;;  %v1376_v27 = vld [vmem:[%s1966_s3 + $0x28] sm:$0xff]  }
 0x323   : > { %v551_v42 = vpack.c.bf16 %v543_v41, %v542_v40 }
 0x325   : > { %1235 = vmatmul.mubr.msk.bf16.vlgmr.msra.gmra.mrb[4].mxu1 %vm421_vm2, %v551_v42 }
 0x326   : > { %1247 = vmatpush3.bf16.msra.mxu1 %v1768_v1  ;;  %1248 = vmatprep.mubr.msk.bf16.mxu1 %vm1571_vm0, %v1570_v0 }
 0x327   : > { %1260 = vmatprep.subr.bf16.mxu1 %v1570_v0 }
 0x32d   : > { %1249 = vmatmul.mubr.msk.bf16.vlgmr.msra.gmra.mrb[8].mxu1 %vm350_vm1, %v1368_v43 }
 0x32e   : > { %1264 = vmatprep.mubr.msk.bf16.mxu1 %vm1571_vm0, %v1570_v0  ;;  %1261 = vmatpush3.bf16.msra.mxu1 %v1373_v6 }
 0x32f   : > { %1262 = vmatprep.subr.bf16.mxu1 %v1570_v0 }
 0x332   : > { %1263 = vmatpush3.bf16.msra.mxu1 %v1374_v7 }
 0x333   : > { %1276 = vmatprep.subr.bf16.mxu1 %v1570_v0 }
 0x3f8   : > { %v607_v47 = vpop.f32.mrb[4].mxu1 }
 0x3f9   : > { %v608_v48 = vadd.f32 %v1844_v46, %v607_v47  ;;  %v1236_v49 = vpop.f32.mrb[5].mxu1 }
 0x3fa   : > { %v610_v50 = vpop.f32.mrb[6].mxu1 }
 0x3fb   : > { %1389 = vtanh.f32 %v608_v48  ;;  %v611_v51 = vadd.f32 %v1844_v46, %v610_v50  ;;  %v1237_v52 = vpop.f32.mrb[7].mxu1 }
 0x3fd   : > { %1391 = vtanh.f32 %v611_v51 }
 0x400   : > { %v727_v53 = vpop.f32.mrb[8].mxu1 }
 0x401   : > { %v728_v54 = vadd.f32 %v1784_v5, %v727_v53  ;;  %v1250_v55 = vpop.f32.mrb[9].mxu1 }
 0x402   : > { %v730_v56 = vpop.f32.mrb[10].mxu1 }
 0x403   : > { %v731_v57 = vadd.f32 %v1784_v5, %v730_v56  ;;  %v1251_v58 = vpop.f32.mrb[11].mxu1  ;;  %1393 = vtanh.f32 %v728_v54 }
 0x405   : > { %v1390_v59 = vpop.eup %1389  ;;  %1395 = vtanh.f32 %v731_v57 }
 0x406   : > { %v616_v61 = vadd.f32 %v1390_v59, %v542_v40 }
 0x407   : > { %v1392_v60 = vpop.eup %1391 }
 0x408   : > { %v617_v62 = vadd.f32 %v1392_v60, %v543_v41 }
 0x40a   : > { %v618_v1 = vpack.c.bf16 %v617_v62, %v616_v61 }
 0x40c   : > { %1243 = vmatmul.mubr.msk.bf16.vlgmr.msra.gmra.mrb[8].mxu0 %vm421_vm2, %v618_v1 }
 0x40d   : > { %1253 = vmatpush3.bf16.msra.mxu0 %v1371_v63  ;;  %1256 = vmatprep.mubr.msk.bf16.mxu0 %vm1571_vm0, %v1570_v0  ;;  %v1394_v3 = vpop.eup %1393 }
 0x40e   : > { %1254 = vmatprep.subr.bf16.mxu0 %v1570_v0 }
 0x40f   : > { %v1396_v4 = vpop.eup %1395 }
 0x410   : > { %v741_v5 = vpack.c.bf16 %v1396_v4, %v1394_v3 }
 0x411   : > { %1255 = vmatpush3.bf16.msra.mxu0 %v1372_v2 }
 0x412   : > { %1268 = vmatprep.subr.bf16.mxu0 %v1570_v0 }
 0x414   : > { %1257 = vmatmul.mubr.msk.bf16.vlgmr.msra.gmra.mrb[12].mxu0 %vm421_vm2, %v741_v5 }
 0x415   : > { %1272 = vmatprep.mubr.msk.bf16.mxu0 %vm1571_vm0, %v1570_v0 }
 0x4df   : > { %v674_v9 = vpop.f32.mrb[8].mxu0 }
 0x4e0   : > { %v675_v10 = vadd.f32 %v1878_v8, %v674_v9  ;;  %v1244_v11 = vpop.f32.mrb[9].mxu0 }
 0x4e1   : > { %v677_v12 = vpop.f32.mrb[10].mxu0 }
 0x4e2   : > { %681 = vst [vmem:[%s1881_s20] sm:$0xff] %v675_v10  ;;  %v678_v13 = vadd.f32 %v1878_v8, %v677_v12  ;;  %v1245_v14 = vpop.f32.mrb[11].mxu0 }
 0x4e4   : > { %682 = vst [vmem:[%s1881_s20 + $0x8] sm:$0xff] %v678_v13 }
 0x4e7   : > { %v797_v15 = vpop.f32.mrb[12].mxu0 }
 0x4e8   : > { %v798_v16 = vadd.f32 %v1802_v17, %v797_v15  ;;  %v1258_v18 = vpop.f32.mrb[13].mxu0 }
 0x4e9   : > { %v800_v19 = vpop.f32.mrb[14].mxu0 }
 0x4ea   : > { %1397 = vtanh.f32 %v798_v16  ;;  %v801_v20 = vadd.f32 %v1802_v17, %v800_v19  ;;  %v1259_v21 = vpop.f32.mrb[15].mxu0  ;;  %v1375_v17 = vld [vmem:[%s1966_s3 + $0x20] sm:$0xff]  }
 0x4eb   : > { %1269 = vmatpush3.bf16.msra.mxu0 %v1375_v17 }
 0x4ec   : > { %1399 = vtanh.f32 %v801_v20  ;;  %1270 = vmatprep.subr.bf16.mxu0 %v1570_v0 }
 0x4ef   : > { %1271 = vmatpush3.bf16.msra.mxu0 %v1376_v27 }
 0x4f4   : > { %v1398_v22 = vpop.eup %1397 }
 0x4f5   : > { %v806_v24 = vadd.f32 %v1398_v22, %v1394_v3 }
 0x4f6   : > { %v1400_v23 = vpop.eup %1399 }
 0x4f7   : > { %v807_v25 = vadd.f32 %v1400_v23, %v1396_v4 }
 0x4f9   : > { %v813_v26 = vpack.c.bf16 %v807_v25, %v806_v24 }
 0x4fb   : > { %1265 = vmatmul.mubr.msk.bf16.vlgmr.msra.gmra.mrb[12].mxu1 %vm421_vm2, %v813_v26 }
 0x4fc   : > { %1277 = vmatpush3.bf16.msra.mxu1 %v1833_v44  ;;  %1280 = vmatprep.mubr.msk.bf16.mxu1 %vm1571_vm0, %v1570_v0 }
 0x4fd   : > { %1278 = vmatprep.subr.bf16.mxu1 %v1570_v0 }
 0x500   : > { %1279 = vmatpush3.bf16.msra.mxu1 %v1837_v45 }
 0x5ce   : > { %v869_v28 = vpop.f32.mrb[12].mxu1 }
 0x5cf   : > { %v870_v29 = vadd.f32 %v1820_v31, %v869_v28  ;;  %v1266_v30 = vpop.f32.mrb[13].mxu1 }
 0x5d0   : > { %v872_v32 = vpop.f32.mrb[14].mxu1 }
 0x5d1   : > { %1401 = vtanh.f32 %v870_v29  ;;  %v873_v33 = vadd.f32 %v1820_v31, %v872_v32  ;;  %v1267_v34 = vpop.f32.mrb[15].mxu1 }
 0x5d3   : > { %1403 = vtanh.f32 %v873_v33 }
 0x5db   : > { %v1402_v35 = vpop.eup %1401 }
 0x5dc   : > { %v878_v37 = vadd.f32 %v1402_v35, %v806_v24 }
 0x5dd   : > { %v1404_v36 = vpop.eup %1403 }
 0x5de   : > { %v879_v38 = vadd.f32 %v1404_v36, %v807_v25 }
 0x5e0   : > { %v885_v0 = vpack.c.bf16 %v879_v38, %v878_v37 }
 0x5e2   : > { %1273 = vmatmul.mubr.msk.bf16.vlgmr.msra.gmra.mrb[16].mxu0 %vm421_vm2, %v885_v0 }
 0x6b5   : > { %v941_v39 = vpop.f32.mrb[16].mxu0 }
 0x6b6   : > { %v942_v40 = vadd.f32 %v1844_v46, %v941_v39  ;;  %v1274_v41 = vpop.f32.mrb[17].mxu0 }
 0x6b7   : > { %v944_v42 = vpop.f32.mrb[18].mxu0 }
 0x6b8   : > { %1405 = vtanh.f32 %v942_v40  ;;  %v945_v43 = vadd.f32 %v1844_v46, %v944_v42  ;;  %v1275_v31 = vpop.f32.mrb[19].mxu0 }
 0x6ba   : > { %1407 = vtanh.f32 %v945_v43 }
 0x6c2   : > { %v1406_v44 = vpop.eup %1405 }
 0x6c3   : > { %v950_v47 = vadd.f32 %v1406_v44, %v878_v37 }
 0x6c4   : > { %v1408_v45 = vpop.eup %1407 }
 0x6c5   : > { %v951_v48 = vadd.f32 %v1408_v45, %v879_v38 }
 0x6c7   : > { %v952_v49 = vpack.c.bf16 %v951_v48, %v950_v47 }
 0x6c9   : > { %1281 = vmatmul.mubr.msk.bf16.vlgmr.msra.gmra.mrb[16].mxu1 %vm421_vm2, %v952_v49 }
 0x79c   : > { %v990_v50 = vpop.f32.mrb[16].mxu1 }
 0x79d   : > { %v991_v51 = vadd.f32 %v1878_v8, %v990_v50  ;;  %v1282_v52 = vpop.f32.mrb[17].mxu1 }
 0x79e   : > { %v993_v46 = vpop.f32.mrb[18].mxu1 }
 0x79f   : > { %997 = vst [vmem:[%s1881_s20 + $0x10] sm:$0xff] %v991_v51  ;;  %v994_v53 = vadd.f32 %v1878_v8, %v993_v46  ;;  %v1283_v54 = vpop.f32.mrb[19].mxu1 }
 0x7a1   : > { %998 = vst [vmem:[%s1881_s20 + $0x18] sm:$0xff] %v994_v53 }
 0x7a2   : > { %1506 = shalt.err (!%p1503_p11)
}
 0x7a3   : > { %s1507_s23 = scalar_lea.hbm %s1915_s15, 512  ;;  %s1511_s10 = scalar_lea.hbm %s1970_s7, 1024 }
 0x7a4   : > { %p1508_p13 = scmp.ne.s32.totalorder %s1915_s15, %s1507_s23  ;;  %p1512_p6 = scmp.lt.u32.totalorder %s1915_s15, %s1970_s7 }
 0x7a5   : > { %p1513_p5 = scmp.lt.u32.totalorder %s1511_s10, %s1507_s23  ;;  %p1515_p9 = scmp.lt.u32.totalorder %s1507_s23, %s1915_s15 }
 0x7a6   : > { %p1509_p1 = pnand %p1508_p13, %p1987_p10 }
 0x7a7   : > { %p1514_p12 = por %p1513_p5, %p1512_p6 }
 0x7a8   : > { %p1510_p0 = pneg %p1509_p1 }
 0x7a9   : > { %p1516_p2 = por %p1515_p9, %p1514_p12 }
 0x7ab   : > { %p1517_p3 = pnand %p1516_p2, %p1510_p0 }
 0x7ad   : > { %1520 = shalt.err (!%p1517_p3)
}
 0x7ae   : > { %s1573_s9 = smov 128   ;;  %s1574_s16 = smov 8  }
 0x7af   : > { %1296 = dma.vmem_to_hbm [thread:$0]  (%p1987_p10), %s1910_s14, 512, %s1915_s15, %s1922_s28, %s1573_s9, %s1573_s9, %s1574_s16  }
 0x7b0 PF: > { %p1318_p4 = scmp.ge.s32.totalorder %s1563_s27, 2  ;;  %s1028_s19 = sand.u32 1, %s1551_s24  }
 0x7b1   : > { %p1988_p7 = scmp.ne.s32.totalorder %s1977_s12, 0  ;;  %s1029_s21 = scalar_lea.sflag [#allocation4], %s1028_s19 }
 0x7b3   : > { %p1309_p8 = pnand %p1318_p4, %p1988_p7 }
 0x7b5   : > { %1546 = dma.done.wait (!%p1309_p8), %s1029_s21, 512  }
 0x7b6   : > { %1548 = vsyncadd (!%p1309_p8), %s1029_s21, 4294966784  ;;  %s1989_s29 = sld [smem:[#allocation12_spill]]  ;;  %p19_p11 = scmp.ge.s32.totalorder %s1640_s30, 4  }
 0x7b7   : > { %s1990_s24 = smov %s1555_s25  ;;  %s1991_s25 = smov %s1559_s26 }
 0x7b8   : > { %s1993_s27 = smov %s1640_s30  ;;  %21 = sbr.rel (!%p19_p11) target bundleno = 7 (0x7), region = 100 }
 0x7bc   : > { %s1992_s26 = smov %s1989_s29 }
 0x7bf   :  { %1034 = vsyncpa [#allocation3], 1 }
 0x7c0   :  { %1036 = vsyncpa [#allocation3 + $0x1], 1 }
 0x7c1   :  { %1037 = vsyncpa [#allocation6], 1 }
 0x7c2   :  { %1038 = vsyncpa [#allocation4], 1 }
 0x7c3   :  { %1040 = vsyncpa [#allocation4 + $0x1], 1 }

</bundles_post_ra>
